<compile_context>
chip_gen: v5e
topology: v5e:2x2
jax: 0.10.0
libtpu: 0.0.40
codegen_flags: <defaults>
</compile_context>

<pallas_src>
import jax
import jax.numpy as jnp
from jax.experimental import pallas as pl
from jax.experimental.pallas import tpu as pltpu


def _ce_kernel(logits_ref, target_ref, out_ref):
    # logits_ref: (TN, C) float    target_ref: (1, TN) int32    out_ref: (1, TN) f32
    x = logits_ref[...].astype(jnp.float32)                          # (TN, C)

    # Numerically-stable logsumexp along the class (lane) axis.
    m = jnp.max(x, axis=-1, keepdims=True)                           # (TN, 1)
    lse = jnp.log(jnp.sum(jnp.exp(x - m), axis=-1, keepdims=True))   # (TN, 1)

    # Lane-dense target row -> per-row column (tiny XLU transpose), then
    # x[i, target[i]] via one-hot select + lane reduce (no gather op needed).
    tgt_col = jnp.transpose(target_ref[...], (1, 0))                 # (TN, 1)
    col = jax.lax.broadcasted_iota(jnp.int32, x.shape, dimension=1)
    picked_x = jnp.sum(jnp.where(col == tgt_col, x, 0.0),
                       axis=-1, keepdims=True)                       # (TN, 1)

    # -log_softmax(x)[t] == m + lse - x[t]
    loss_col = (m + lse) - picked_x                                   # (TN, 1)

    # Lane-dense output store (unmasked vst); transpose is free-ish XLU work.
    out_ref[...] = jnp.transpose(loss_col, (1, 0))                    # (1, TN)


def cross_entropy_loss(logits, target, *, tile_n=None,
                       vmem_limit_bytes=32 * 1024 * 1024,
                       logits_buffers=2):
    """Per-sample cross entropy: -log_softmax(logits)[i, target[i]] -> [N] f32."""
    N, C = logits.shape
    LANE, SUBLANE = 128, 8
    elem = jnp.dtype(logits.dtype).itemsize
    c_pad = pl.cdiv(C, LANE) * LANE            # lane-padded class width in VMEM

    tgt_row = target.astype(jnp.int32).reshape(1, N)     # lane-dense target layout

    if tile_n is None:
        # Padded VMEM bytes per batch row across all pipelined blocks:
        #   logits : c_pad * elem bytes            x logits_buffers
        #   target : (1, tile_n) i32 pads to 8 sublanes -> 8*4 B/col  x 2 buffers
        #   output : (1, tile_n) f32, same              -> 8*4 B/col  x 2 buffers
        budget = int(vmem_limit_bytes * 0.85)   # headroom for Mosaic internal scratch
        per_row = (c_pad * elem * logits_buffers
                   + 2 * (SUBLANE * 4)          # target blocks
                   + 2 * (SUBLANE * 4))         # output blocks
        tile_n = max(LANE, budget // per_row)
        # v7x megacore: keep >= 4 grid steps (2 per TensorCore, so each core still
        # double-buffers its DMAs) whenever N is big enough to split.
        if N > 4 * LANE:
            tile_n = min(tile_n, pl.cdiv(N, 4))
    tile_n = int(tile_n)

    if tile_n >= N:
        tile_n, grid_n = N, 1                   # single tile: blocks == full arrays
    else:
        # Multi-tile: lane-dense (1, tile_n) blocks need tile_n % 128 == 0.
        tile_n = max(LANE, (tile_n // LANE) * LANE)
        if tile_n >= N:
            tile_n, grid_n = N, 1
        else:
            grid_n = pl.cdiv(N, tile_n)

    if logits_buffers == 2:
        logits_spec = pl.BlockSpec((tile_n, C), lambda i: (i, 0))
    else:
        # e.g. logits_buffers=3 on v5e if the streaming DMA is exposed.
        logits_spec = pl.BlockSpec((tile_n, C), lambda i: (i, 0),
                                   pipeline_mode=pl.Buffered(logits_buffers))

    cost = pl.CostEstimate(
        flops=5 * N * C,                         # sub, cmp, select, adds per element
        transcendentals=N * C + N,               # exp per element + log per row
        bytes_accessed=N * C * elem + 4 * N + 4 * N,   # logits + i32 tgt + f32 out
    )

    out = pl.pallas_call(
        _ce_kernel,
        out_shape=jax.ShapeDtypeStruct((1, N), jnp.float32),
        grid=(grid_n,),
        in_specs=[
            logits_spec,                                   # (tile_n, C) logits tile
            pl.BlockSpec((1, tile_n), lambda i: (0, i)),   # lane-dense targets
        ],
        out_specs=pl.BlockSpec((1, tile_n), lambda i: (0, i)),  # lane-dense output
        compiler_params=pltpu.CompilerParams(
            dimension_semantics=("parallel",),   # rows independent; shards TCs on v7x
            vmem_limit_bytes=vmem_limit_bytes,
        ),
        cost_estimate=cost,
    )(logits, tgt_row)

    return out[0]


if __name__ == "__main__":
    key = jax.random.PRNGKey(0)
    k1, k2, k3, k4, k5, k6 = jax.random.split(key, 6)

    # Small demo consistent with the module: batch of 8 samples, 32 classes.
    N, C = 8, 32
    logits = jax.random.normal(k1, (N, C), dtype=jnp.float32)
    target = jax.random.randint(k2, (N,), 0, C, dtype=jnp.int32)

    loss = jax.block_until_ready(cross_entropy_loss(logits, target))
    ref = -jax.nn.log_softmax(logits, axis=-1)[jnp.arange(N), target]
    assert loss.shape == (N,)
    assert jnp.allclose(loss, ref, atol=1e-5, rtol=1e-5)

    # FRCNN-ish ragged case: multi-tile grid with a padded tail tile
    # (N2 = 200 not a multiple of tile_n = 128) and a sub-128 class dim.
    N2, C2 = 200, 21
    logits2 = jax.random.normal(k3, (N2, C2), dtype=jnp.float32)
    target2 = jax.random.randint(k4, (N2,), 0, C2, dtype=jnp.int32)

    loss2 = jax.block_until_ready(cross_entropy_loss(logits2, target2, tile_n=128))
    ref2 = -jax.nn.log_softmax(logits2, axis=-1)[jnp.arange(N2), target2]
    assert loss2.shape == (N2,)
    assert jnp.allclose(loss2, ref2, atol=1e-5, rtol=1e-5)

    # Larger batch, bf16 logits: exercises the auto tile heuristic (grid_n >= 4
    # cap for v7x megacore) and the bf16 input path.
    N3, C3 = 640, 81
    logits3 = jax.random.normal(k5, (N3, C3), dtype=jnp.float32).astype(jnp.bfloat16)
    target3 = jax.random.randint(k6, (N3,), 0, C3, dtype=jnp.int32)

    loss3 = jax.block_until_ready(cross_entropy_loss(logits3, target3))
    ref3 = -jax.nn.log_softmax(logits3.astype(jnp.float32), axis=-1)[
        jnp.arange(N3), target3]
    assert loss3.shape == (N3,)
    assert jnp.allclose(loss3, ref3, atol=1e-4, rtol=1e-4)

    print("KERNEL_OK")
</pallas_src>

<mosaic_0001>
module attributes {stable_mosaic.version = 11 : i64} {
  func.func @_ce_kernel(%arg0: i32, %arg1: memref<8x32xf32, #tpu.memory_space<vmem>>, %arg2: memref<1x8xi32, #tpu.memory_space<vmem>>, %arg3: memref<1x8xf32, #tpu.memory_space<vmem>>) attributes {dimension_semantics = [#tpu.dimension_semantics<parallel>], iteration_bounds = array<i64: 1>, scalar_prefetch = 0 : i64, scratch_operands = 0 : i64, tpu.core_type = #tpu.core_type<tc>, window_params = [{transform_indices = @transform_0, window_bounds = array<i64: 8, 32>}, {transform_indices = @transform_1, window_bounds = array<i64: 1, 8>}, {transform_indices = @transform_2, window_bounds = array<i64: 1, 8>}]} {
    %c0 = arith.constant 0 : index
    %c0_0 = arith.constant 0 : index
    %0 = vector.load %arg1[%c0, %c0_0] : memref<8x32xf32, #tpu.memory_space<vmem>>, vector<8x32xf32>
    %cst = arith.constant dense<0xFF800000> : vector<8xf32>
    %1 = vector.multi_reduction <maximumf>, %0, %cst [1] : vector<8x32xf32> to vector<8xf32>
    %2 = vector.shape_cast %1 : vector<8xf32> to vector<8x1xf32>
    %3 = vector.broadcast %2 : vector<8x1xf32> to vector<8x32xf32>
    %4 = arith.subf %0, %3 : vector<8x32xf32>
    %5 = math.exp %4 : vector<8x32xf32>
    %cst_1 = arith.constant dense<0.000000e+00> : vector<8xf32>
    %6 = vector.multi_reduction <add>, %5, %cst_1 [1] : vector<8x32xf32> to vector<8xf32>
    %7 = vector.shape_cast %6 : vector<8xf32> to vector<8x1xf32>
    %8 = math.log %7 : vector<8x1xf32>
    %c0_2 = arith.constant 0 : index
    %c0_3 = arith.constant 0 : index
    %9 = vector.load %arg2[%c0_2, %c0_3] : memref<1x8xi32, #tpu.memory_space<vmem>>, vector<1x8xi32>
    %10 = tpu.transpose %9, [1, 0] : vector<1x8xi32> -> vector<8x1xi32>
    %11 = tpu.iota {dimensions = array<i32: 1>} : vector<8x32xi32>
    %12 = vector.broadcast %10 : vector<8x1xi32> to vector<8x32xi32>
    %13 = arith.cmpi eq, %11, %12 : vector<8x32xi32>
    %cst_4 = arith.constant 0.000000e+00 : f32
    %14 = vector.broadcast %cst_4 : f32 to vector<8x32xf32>
    %15 = arith.select %13, %0, %14 : vector<8x32xi1>, vector<8x32xf32>
    %cst_5 = arith.constant dense<0.000000e+00> : vector<8xf32>
    %16 = vector.multi_reduction <add>, %15, %cst_5 [1] : vector<8x32xf32> to vector<8xf32>
    %17 = vector.shape_cast %16 : vector<8xf32> to vector<8x1xf32>
    %18 = arith.addf %2, %8 : vector<8x1xf32>
    %19 = arith.subf %18, %17 : vector<8x1xf32>
    %20 = tpu.transpose %19, [1, 0] : vector<8x1xf32> -> vector<1x8xf32>
    %c0_6 = arith.constant 0 : index
    %c0_7 = arith.constant 0 : index
    %21 = vector.load %arg3[%c0_6, %c0_7] : memref<1x8xf32, #tpu.memory_space<vmem>>, vector<1x8xf32>
    tpu.vector_store %arg3[%c0_6, %c0_7], %20 {strides = array<i32>} : memref<1x8xf32, #tpu.memory_space<vmem>>, vector<1x8xf32>,
    return
  }
  func.func @transform_0(%arg0: i32) -> (i32, i32) {
    %c0_i32 = arith.constant 0 : i32
    %c0_i32_0 = arith.constant 0 : i32
    return %arg0, %c0_i32 : i32, i32
  }
  func.func @transform_1(%arg0: i32) -> (i32, i32) {
    %c0_i32 = arith.constant 0 : i32
    %c0_i32_0 = arith.constant 0 : i32
    return %c0_i32, %arg0 : i32, i32
  }
  func.func @transform_2(%arg0: i32) -> (i32, i32) {
    %c0_i32 = arith.constant 0 : i32
    %c0_i32_0 = arith.constant 0 : i32
    return %c0_i32, %arg0 : i32, i32
  }
}

</mosaic_0001>

<bundles_post_ra>
// kernel: tpu_custom_call.1
= control target key start
LH: loop header
LB: loop body
LE: loop exit
PB: predicated region body
PF: predicated region fallthrough
CT: control target
= control target key end

     0   :  { %7 = vsyncpa [#allocation3], 0  ;;  %s270_s0 = inlined_call_operand.hbm [shape: f32[8,32], index: 0, kind: input, shape index: {}]   ;;  %s271_s1 = inlined_call_operand.hbm [shape: s32[1,8], index: 1, kind: input, shape index: {}]   ;;  %s272_s2 = inlined_call_operand.hbm [shape: f32[1,8], index: 2, kind: output, shape index: {}]  }
   0x1   :  { %8 = vsyncpa [#allocation6], 0 }
   0x2   :  { %9 = vsyncpa [#allocation4], 0  ;;  %s15_s11 = sshll.u32 %s270_s0, 4  ;;  %s239_s12 = smov [#allocation2]   ;;  %s16_s11 = int_to_ptr.hbm [resolvable:$true] %s15_s11 }
   0x3   :  { %s17_s13 = sshll.u32 %s239_s12, 4  ;;  %s26_s16 = sshll.u32 %s271_s1, 4  ;;  %s18_s13 = int_to_ptr.vmem [resolvable:$true] %s17_s13  ;;  %s27_s16 = int_to_ptr.hbm [resolvable:$true] %s26_s16 }
   0x4   :  { %20 = dma.hbm_to_vmem [thread:$0]  %s16_s11, 128, %s18_s13, [#allocation3]  }
   0x5   :  { %s240_s17 = smov [#allocation5]  }
   0x6   :  { %s28_s18 = sshll.u32 %s240_s17, 4  ;;  %s29_s18 = int_to_ptr.vmem [resolvable:$true] %s28_s18 }
   0x7   :  { %31 = dma.hbm_to_vmem [thread:$0]  %s27_s16, 16, %s29_s18, [#allocation6]  }
   0x8   :  { %233 = dma.done.wait [#allocation3], 128  }
   0x9   :  { %234 = vsyncadd [#allocation3], 4294967168 }
   0xa   :  { %235 = dma.done.wait [#allocation6], 16  }
   0xb   :  { %236 = vsyncadd [#allocation6], 4294967280  ;;  %vm41_vm0 = vcmask 261120   ;;  %v40_v0 = vld [vmem:[#allocation2] sm:$0xff]  ;;  %v53_v2 = vld [vmem:[#allocation5] sm:$0x1]  ;;  %v86_v10 = vlaneseq }
   0xc   :  { %v42_v1 = vsel %vm41_vm0, %v40_v0, -inf  ;;  %v241_v3 = vmov 0   ;;  %s242_s0 = smov [#allocation7]   ;;  %s139_s21 = sshll.u32 %s272_s2, 4  ;;  %vm130_vm2 = vcmask 57344   ;;  %s140_s21 = int_to_ptr.hbm [resolvable:$true] %s139_s21 }
   0xd   :  { %43 = vmax.xlane.f32.xlu0 %v42_v1  ;;  %155 = vset.pattern.permute.xlu1 %v241_v3  ;;  %v87_v11 = vand.u32 127, %v86_v10  ;;  %s137_s1 = sshll.u32 %s242_s0, 4  ;;  %s138_s1 = int_to_ptr.vmem [resolvable:$true] %s137_s1 }
  0x36   :  { %54 = vxpose.xlu0.b32.start.end [1/1] (short) (narrow) %v53_v2, 8 }
  0x80   :  { %v44_v4 = vpop.xlane.xlu0 %43 }
  0x81   :  { %v45_v6 = vsub.f32 %v40_v0, %v44_v4 }
  0x83   :  { %v46_v7 = vmul.f32 1.442695, %v45_v6 }
  0x85   :  { %157 = vpow2.f32 %v46_v7 }
  0x8b   :  { %v158_v8 = vpop.eup %157 }
  0x8c   :  { %v48_v9 = vsel %vm41_vm0, %v158_v8, 0.0 }
  0x9d   :  { %156 = vset.pattern.permute.xlu0 %v241_v3 }
  0xda   :  { %v70_v5 = vpop.trf.xlu0 }
  0xdb   :  { %89 = vperm.xlu1 %155, %v70_v5  }
 0x105   :  { %49 = vadd.xlane.f32.xlu1 %v48_v9 }
 0x14d   :  { %v90_v12 = vpop.permute.xlu1 %89 }
 0x14e   :  { %vm91_vm1 = vcmp.eq.s32.totalorder %v87_v11, %v90_v12 }
 0x14f   :  { %v92_v13 = vsel %vm91_vm1, %v40_v0, 0.0 }
 0x150   :  { %v93_v14 = vsel %vm41_vm0, %v92_v13, 0.0 }
 0x151   :  { %94 = vadd.xlane.f32.xlu2 %v93_v14 }
 0x178   :  { %v50_v15 = vpop.xlane.xlu1 %49 }
 0x179   :  { %159 = vlog2.f32 %v50_v15 }
 0x17f   :  { %v160_v16 = vpop.eup %159 }
 0x180   :  { %v52_v17 = vmul.f32 0.6931472, %v160_v16 }
 0x182   :  { %v96_v18 = vadd.f32 %v52_v17, %v44_v4 }
 0x1c4   :  { %v95_v19 = vpop.xlane.xlu2 %94 }
 0x1c5   :  { %v97_v20 = vsub.f32 %v96_v18, %v95_v19 }
 0x1c7   :  { %98 = vxpose.xlu2.b32.start.end [1/1] (short) (narrow) %v97_v20, 8 }
 0x260   :  { %v114_v21 = vpop.trf.xlu2 }
 0x261   :  { %131 = vst.msk [vmem:[#allocation7] sm:$0x1] %vm130_vm2, %v114_v21 }
 0x262   :  { %142 = dma.vmem_to_hbm [thread:$0]  %s138_s1, 16, %s140_s21, [#allocation4]  }
 0x263   :  { %237 = dma.done.wait [#allocation4], 16  }
 0x264   :  { %238 = vsyncadd [#allocation4], 4294967280 }
 0x265   :  { %147 = vsyncpa [#allocation3], 1 }
 0x266   :  { %148 = vsyncpa [#allocation6], 1 }
 0x267   :  { %149 = vsyncpa [#allocation4], 1 }

</bundles_post_ra>
